<compile_context>
chip_gen: v7x
topology: tpu7x:2x2x1
jax: 0.10.0
libtpu: 0.0.40
codegen_flags: <defaults>
</compile_context>

<pallas_src>
import jax
import jax.numpy as jnp
from jax.experimental import pallas as pl
from jax.experimental.pallas import tpu as pltpu  # noqa: F401  (TPU backend)


def _round_up(x, m):
    return (x + m - 1) // m * m


# ------------------------------ fused kernel --------------------------------
def _fused_proto_kernel(x_ref, w_ref, b_ref, ohT_ref, o_ref):
    # ---- backbone (support + query fused): z = relu(x @ W + b) ----
    # bf16 MXU inputs, f32 accumulation; bias / ReLU epilogue stays f32.
    z = jnp.dot(x_ref[...], w_ref[...], preferred_element_type=jnp.float32)
    z = jnp.maximum(z + b_ref[...], 0.0)                        # (N_pad, F_pad) f32

    # ---- per-class mean prototypes: oh^T @ z, scaled by 1/count ----
    ohT = ohT_ref[...]                                          # (C_pad, N_pad) f32
    counts = jnp.sum(ohT, axis=1, keepdims=True)                # (C_pad, 1)
    # Guard: empty (or padded) classes get count clamped to 1 -> zero prototype
    # instead of inf/NaN.
    invc = pl.reciprocal(jnp.maximum(counts, 1.0), approx=True)
    proto = jnp.dot(ohT, z, preferred_element_type=jnp.float32) * invc  # (C_pad, F_pad)

    # ---- euclidean cdist for all rows vs prototypes; scores = -dists ----
    q_sq = jnp.sum(z * z, axis=1, keepdims=True)                # (N_pad, 1)
    p_sq = jnp.sum(proto * proto, axis=1, keepdims=True)        # (C_pad, 1)
    cross = jnp.einsum("nf,cf->nc", z, proto,
                       preferred_element_type=jnp.float32)      # (N_pad, C_pad)
    d2 = jnp.maximum(q_sq + jnp.transpose(p_sq) - 2.0 * cross, 0.0)
    o_ref[...] = -jnp.sqrt(d2)


# ------------------------------- full forward -------------------------------
def prototypical_network_forward(support_images, support_labels, query_images,
                                 w, b, num_classes):
    ns = support_images.shape[0]
    nq = query_images.shape[0]
    d_in = support_images.shape[1] * support_images.shape[2] * support_images.shape[3]
    feat = w.shape[1]

    ns_pad = _round_up(ns, 8)          # sublane-pad the support segment
    nq_pad = _round_up(nq, 8)          # sublane-pad the query segment
    n_pad = ns_pad + nq_pad
    feat_pad = _round_up(feat, 128)    # lane-dense embeddings
    c_pad = _round_up(num_classes, 128)  # lane-dense score output

    # Flatten + concat support/query rows; zero-pad each segment so the query
    # block starts at a sublane-aligned row.
    xs = support_images.reshape(ns, d_in).astype(jnp.float32)
    xq = query_images.reshape(nq, d_in).astype(jnp.float32)
    x_all = jnp.zeros((n_pad, d_in), jnp.float32)
    x_all = x_all.at[:ns].set(xs).at[ns_pad:ns_pad + nq].set(xq)
    x_bf16 = x_all.astype(jnp.bfloat16)

    # Zero-pad FEAT -> feat_pad (padded features are relu(0+0)=0, distances
    # unaffected).  Weights in bf16 for the MXU; bias stays f32.
    w_pad = jnp.zeros((d_in, feat_pad), jnp.float32).at[:, :feat].set(
        w.astype(jnp.float32)).astype(jnp.bfloat16)
    b_pad = jnp.zeros((1, feat_pad), jnp.float32).at[0, :feat].set(
        b.astype(jnp.float32))

    # Pre-transposed one-hot: (C_pad, N_pad); only real support columns nonzero.
    oh = jax.nn.one_hot(support_labels, c_pad, dtype=jnp.float32)   # (ns, C_pad)
    ohT = jnp.zeros((c_pad, n_pad), jnp.float32).at[:, :ns].set(oh.T)

    scores_pad = pl.pallas_call(
        _fused_proto_kernel,
        out_shape=jax.ShapeDtypeStruct((n_pad, c_pad), jnp.float32),
        grid=(1,),
        in_specs=[
            pl.BlockSpec((n_pad, d_in), lambda i: (0, 0)),
            pl.BlockSpec((d_in, feat_pad), lambda i: (0, 0)),
            pl.BlockSpec((1, feat_pad), lambda i: (0, 0)),
            pl.BlockSpec((c_pad, n_pad), lambda i: (0, 0)),
        ],
        out_specs=pl.BlockSpec((n_pad, c_pad), lambda i: (0, 0)),
    )(x_bf16, w_pad, b_pad, ohT)

    # Slice out the real query rows and real classes.
    return scores_pad[ns_pad:ns_pad + nq, :num_classes]


# ------------------------------------ main -----------------------------------
if __name__ == "__main__":
    key = jax.random.PRNGKey(0)
    k_w, k_b, k_s, k_q = jax.random.split(key, 4)

    C, H, W = 4, 16, 16
    FEAT = 64
    N_CLASSES = 5
    N_SHOT = 2      # support per class
    N_QUERY = 3     # query per class
    NS = N_CLASSES * N_SHOT    # 10 support images
    NQ = N_CLASSES * N_QUERY   # 15 query images
    D_IN = C * H * W           # 1024

    # deterministic synthetic backbone params
    w_lin = jax.random.normal(k_w, (D_IN, FEAT), dtype=jnp.float32) * 0.02
    b_lin = jax.random.normal(k_b, (FEAT,), dtype=jnp.float32) * 0.02

    support_images = jax.random.normal(k_s, (NS, C, H, W), dtype=jnp.float32)
    query_images = jax.random.normal(k_q, (NQ, C, H, W), dtype=jnp.float32)
    support_labels = jnp.repeat(jnp.arange(N_CLASSES, dtype=jnp.int32), N_SHOT)

    scores = prototypical_network_forward(
        support_images, support_labels, query_images, w_lin, b_lin, N_CLASSES)
    scores = jax.block_until_ready(scores)

    # quick sanity: pure-JAX reference with matching numerics
    # (bf16 MXU matmul, f32 epilogue, direct-difference distances)
    def ref_forward():
        xs = support_images.reshape(NS, D_IN).astype(jnp.bfloat16)
        xq = query_images.reshape(NQ, D_IN).astype(jnp.bfloat16)
        wb = w_lin.astype(jnp.bfloat16)
        zs = jnp.maximum(
            jnp.dot(xs, wb, preferred_element_type=jnp.float32) + b_lin, 0.0)
        zq = jnp.maximum(
            jnp.dot(xq, wb, preferred_element_type=jnp.float32) + b_lin, 0.0)
        proto = jnp.stack(
            [zs[support_labels == c_].mean(axis=0) for c_ in range(N_CLASSES)])
        d = jnp.sqrt(jnp.sum((zq[:, None, :] - proto[None, :, :]) ** 2, axis=-1))
        return -d

    ref = ref_forward()
    assert scores.shape == (NQ, N_CLASSES)
    assert jnp.allclose(scores, ref, atol=1e-2, rtol=1e-2), (
        "max abs err %f" % float(jnp.max(jnp.abs(scores - ref))))

    print("KERNEL_OK")
</pallas_src>

<mosaic_0001>
module attributes {stable_mosaic.version = 11 : i64} {
  func.func @_fused_proto_kernel(%arg0: i32, %arg1: memref<32x1024xbf16, #tpu.memory_space<vmem>>, %arg2: memref<1024x128xbf16, #tpu.memory_space<vmem>>, %arg3: memref<1x128xf32, #tpu.memory_space<vmem>>, %arg4: memref<128x32xf32, #tpu.memory_space<vmem>>, %arg5: memref<32x128xf32, #tpu.memory_space<vmem>>) attributes {dimension_semantics = [#tpu.dimension_semantics<arbitrary>], iteration_bounds = array<i64: 1>, scalar_prefetch = 0 : i64, scratch_operands = 0 : i64, tpu.core_type = #tpu.core_type<tc>, window_params = [{pipeline_mode = #tpu.pipeline_mode<synchronous>, transform_indices = @transform_0, window_bounds = array<i64: 32, 1024>}, {pipeline_mode = #tpu.pipeline_mode<synchronous>, transform_indices = @transform_1, window_bounds = array<i64: 1024, 128>}, {pipeline_mode = #tpu.pipeline_mode<synchronous>, transform_indices = @transform_2, window_bounds = array<i64: 1, 128>}, {pipeline_mode = #tpu.pipeline_mode<synchronous>, transform_indices = @transform_3, window_bounds = array<i64: 128, 32>}, {pipeline_mode = #tpu.pipeline_mode<synchronous>, transform_indices = @transform_4, window_bounds = array<i64: 32, 128>}]} {
    %c0 = arith.constant 0 : index
    %c0_0 = arith.constant 0 : index
    %0 = vector.load %arg1[%c0, %c0_0] : memref<32x1024xbf16, #tpu.memory_space<vmem>>, vector<32x1024xbf16>
    %c0_1 = arith.constant 0 : index
    %c0_2 = arith.constant 0 : index
    %1 = vector.load %arg2[%c0_1, %c0_2] : memref<1024x128xbf16, #tpu.memory_space<vmem>>, vector<1024x128xbf16>
    %cst = arith.constant dense<0.000000e+00> : vector<32x128xf32>
    %2 = tpu.matmul %0, %1, %cst {dimension_numbers = #tpu.dot_dimension_numbers<[1], [0], [0], [1], [0, 0, 1, 1], [], []>} : vector<32x1024xbf16>, vector<1024x128xbf16>, vector<32x128xf32> -> vector<32x128xf32>
    %c0_3 = arith.constant 0 : index
    %c0_4 = arith.constant 0 : index
    %3 = vector.load %arg3[%c0_3, %c0_4] : memref<1x128xf32, #tpu.memory_space<vmem>>, vector<1x128xf32>
    %4 = vector.broadcast %3 : vector<1x128xf32> to vector<32x128xf32>
    %5 = arith.addf %2, %4 : vector<32x128xf32>
    %cst_5 = arith.constant 0.000000e+00 : f32
    %6 = vector.broadcast %cst_5 : f32 to vector<32x128xf32>
    %7 = arith.maximumf %5, %6 : vector<32x128xf32>
    %c0_6 = arith.constant 0 : index
    %c0_7 = arith.constant 0 : index
    %8 = vector.load %arg4[%c0_6, %c0_7] : memref<128x32xf32, #tpu.memory_space<vmem>>, vector<128x32xf32>
    %cst_8 = arith.constant dense<0.000000e+00> : vector<128xf32>
    %9 = vector.multi_reduction <add>, %8, %cst_8 [1] : vector<128x32xf32> to vector<128xf32>
    %10 = vector.shape_cast %9 : vector<128xf32> to vector<128x1xf32>
    %cst_9 = arith.constant 1.000000e+00 : f32
    %11 = vector.broadcast %cst_9 : f32 to vector<128x1xf32>
    %12 = arith.maximumf %10, %11 : vector<128x1xf32>
    %13 = tpu.reciprocal %12 {approx = true} : vector<128x1xf32> -> vector<128x1xf32>
    %cst_10 = arith.constant dense<0.000000e+00> : vector<128x128xf32>
    %14 = tpu.matmul %8, %7, %cst_10 {dimension_numbers = #tpu.dot_dimension_numbers<[1], [0], [0], [1], [0, 0, 1, 1], [], []>} : vector<128x32xf32>, vector<32x128xf32>, vector<128x128xf32> -> vector<128x128xf32>
    %15 = vector.broadcast %13 : vector<128x1xf32> to vector<128x128xf32>
    %16 = arith.mulf %14, %15 : vector<128x128xf32>
    %17 = arith.mulf %7, %7 : vector<32x128xf32>
    %cst_11 = arith.constant dense<0.000000e+00> : vector<32xf32>
    %18 = vector.multi_reduction <add>, %17, %cst_11 [1] : vector<32x128xf32> to vector<32xf32>
    %19 = vector.shape_cast %18 : vector<32xf32> to vector<32x1xf32>
    %20 = arith.mulf %16, %16 : vector<128x128xf32>
    %cst_12 = arith.constant dense<0.000000e+00> : vector<128xf32>
    %21 = vector.multi_reduction <add>, %20, %cst_12 [1] : vector<128x128xf32> to vector<128xf32>
    %22 = vector.shape_cast %21 : vector<128xf32> to vector<128x1xf32>
    "tpu.trace_start"() <{level = 10 : i32, message = "nf,cf->nc"}> : () -> ()
    %cst_13 = arith.constant dense<0.000000e+00> : vector<32x128xf32>
    %23 = tpu.matmul %7, %16, %cst_13 {dimension_numbers = #tpu.dot_dimension_numbers<[1], [1], [0], [0], [0, 0, 1, 0], [], []>} : vector<32x128xf32>, vector<128x128xf32>, vector<32x128xf32> -> vector<32x128xf32>
    "tpu.trace_stop"() : () -> ()
    %24 = tpu.transpose %22, [1, 0] : vector<128x1xf32> -> vector<1x128xf32>
    %25 = vector.broadcast %19 : vector<32x1xf32> to vector<32x128xf32>
    %26 = vector.broadcast %24 : vector<1x128xf32> to vector<32x128xf32>
    %27 = arith.addf %25, %26 : vector<32x128xf32>
    %cst_14 = arith.constant 2.000000e+00 : f32
    %28 = vector.broadcast %cst_14 : f32 to vector<32x128xf32>
    %29 = arith.mulf %28, %23 : vector<32x128xf32>
    %30 = arith.subf %27, %29 : vector<32x128xf32>
    %cst_15 = arith.constant 0.000000e+00 : f32
    %31 = vector.broadcast %cst_15 : f32 to vector<32x128xf32>
    %32 = arith.maximumf %30, %31 : vector<32x128xf32>
    %33 = math.sqrt %32 : vector<32x128xf32>
    %cst_16 = arith.constant 0.000000e+00 : f32
    %34 = vector.broadcast %cst_16 : f32 to vector<32x128xf32>
    %35 = arith.subf %34, %33 : vector<32x128xf32>
    %c0_17 = arith.constant 0 : index
    %c0_18 = arith.constant 0 : index
    %36 = vector.load %arg5[%c0_17, %c0_18] : memref<32x128xf32, #tpu.memory_space<vmem>>, vector<32x128xf32>
    tpu.vector_store %arg5[%c0_17, %c0_18], %35 {strides = array<i32>} : memref<32x128xf32, #tpu.memory_space<vmem>>, vector<32x128xf32>,
    return
  }
  func.func @transform_0(%arg0: i32) -> (i32, i32) {
    %c0_i32 = arith.constant 0 : i32
    %c0_i32_0 = arith.constant 0 : i32
    %c0_i32_1 = arith.constant 0 : i32
    return %c0_i32, %c0_i32_0 : i32, i32
  }
  func.func @transform_1(%arg0: i32) -> (i32, i32) {
    %c0_i32 = arith.constant 0 : i32
    %c0_i32_0 = arith.constant 0 : i32
    %c0_i32_1 = arith.constant 0 : i32
    return %c0_i32, %c0_i32_0 : i32, i32
  }
  func.func @transform_2(%arg0: i32) -> (i32, i32) {
    %c0_i32 = arith.constant 0 : i32
    %c0_i32_0 = arith.constant 0 : i32
    %c0_i32_1 = arith.constant 0 : i32
    return %c0_i32, %c0_i32_0 : i32, i32
  }
  func.func @transform_3(%arg0: i32) -> (i32, i32) {
    %c0_i32 = arith.constant 0 : i32
    %c0_i32_0 = arith.constant 0 : i32
    %c0_i32_1 = arith.constant 0 : i32
    return %c0_i32, %c0_i32_0 : i32, i32
  }
  func.func @transform_4(%arg0: i32) -> (i32, i32) {
    %c0_i32 = arith.constant 0 : i32
    %c0_i32_0 = arith.constant 0 : i32
    %c0_i32_1 = arith.constant 0 : i32
    return %c0_i32, %c0_i32_0 : i32, i32
  }
}

</mosaic_0001>

<bundles_post_ra>
// kernel: tpu_custom_call.1
= control target key start
LH: loop header
LB: loop body
LE: loop exit
PB: predicated region body
PF: predicated region fallthrough
CT: control target
= control target key end

     0   :  { %9 = vsyncpa [#allocation3], 0  ;;  %s2191_s0 = inlined_call_operand.vmem [shape: bf16[32,1024], index: 0, kind: input, shape index: {}]   ;;  %s2192_s1 = inlined_call_operand.hbm [shape: bf16[1024,128], index: 1, kind: input, shape index: {}]   ;;  %s2193_s2 = inlined_call_operand.vmem [shape: f32[1,128], index: 2, kind: input, shape index: {}]   ;;  %s2194_s3 = inlined_call_operand.vmem [shape: f32[128,32], index: 3, kind: input, shape index: {}]   ;;  %s2195_s4 = inlined_call_operand.hbm [shape: f32[32,128], index: 4, kind: output, shape index: {}]  }
   0x1   :  { %10 = vsyncpa [#allocation4], 0  ;;  %s1921_s15 = smov [#allocation2]   ;;  %s1873_s19 = scalar_lea.hbm %s2192_s1, 8192 }
   0x2   :  { %s18_s16 = sshll.u32 %s1921_s15, 4  ;;  %p1874_p0 = scmp.ne.s32.totalorder %s2192_s1, %s1873_s19  ;;  %s19_s16 = int_to_ptr.vmem [resolvable:$true] %s18_s16 }
   0x3   :  { %p1877_p1 = scmp.lt.u32.totalorder %s1873_s19, %s2192_s1 }
   0x5   :  { %p1879_p2 = pnand %p1877_p1, %p1874_p0 }
   0x7   :  { %1882 = shalt.err (!%p1879_p2)
}
   0x8   :  { %s1883_s24 = scalar_lea.vmem %s19_s16, 8192  ;;  %p1888_p4 = scmp.lt.s32.totalorder %s19_s16, %s19_s16 }
   0x9   :  { %p1884_p3 = scmp.ne.s32.totalorder %s19_s16, %s1883_s24  ;;  %p1889_p5 = scmp.lt.s32.totalorder %s1883_s24, %s1883_s24 }
   0xb   :  { %p1890_p6 = por %p1889_p5, %p1888_p4 }
   0xd   :  { %p1891_p7 = pnand %p1890_p6, %p1884_p3 }
   0xf   :  { %1894 = shalt.err (!%p1891_p7)
}
  0x10   :  { %s1922_s25 = smov 64   ;;  %s1923_s26 = smov 4  }
  0x11   :  { %24 = dma.hbm_to_vmem [thread:$0]  %s2192_s1, 8192, %s19_s16, [#allocation3], %s1922_s25, %s1922_s25, %s1923_s26  }
  0x12   :  { %1917 = dma.done.wait [#allocation3], 8192  }
  0x13   :  { %1918 = vsyncadd [#allocation3], 4294959104  ;;  %v1769_v0 = vld [vmem:[#allocation2 + $0x40] sm:$0xff]   ;;  %v1773_v4 = vld [vmem:[#allocation2 + $0x48] sm:$0xff]   ;;  %vm864_vm0 = vcmask 261120  }
  0x14   :  { %v1770_v1 = vld [vmem:[#allocation2 + $0xc0] sm:$0xff]   ;;  %1501 = vmatprep.subr.bf16.mxu0 %v1769_v0  ;;  %v1774_v5 = vld [vmem:[#allocation2 + $0xc8] sm:$0xff]   ;;  %v1777_v8 = vld [vmem:[#allocation2 + $0x50] sm:$0xff]  }
  0x15   :  { %v1771_v2 = vld [vmem:[#allocation2] sm:$0xff]   ;;  %1529 = vmatprep.subr.bf16.mxu1 %v1770_v1  ;;  %v1775_v6 = vld [vmem:[#allocation2 + $0x8] sm:$0xff]   ;;  %v1778_v9 = vld [vmem:[#allocation2 + $0xd0] sm:$0xff]  }
  0x16   :  { %v1772_v3 = vld [vmem:[#allocation2 + $0x80] sm:$0xff]   ;;  %1502 = vmatpush3.bf16.msra.mxu0 %v1771_v2  ;;  %v1776_v7 = vld [vmem:[#allocation2 + $0x88] sm:$0xff]   ;;  %v1779_v10 = vld [vmem:[#allocation2 + $0x10] sm:$0xff]  }
  0x17   :  { %1530 = vmatpush3.bf16.msra.mxu1 %v1772_v3  ;;  %1503 = vmatprep.subr.bf16.mxu0 %v1773_v4  ;;  %v1780_v11 = vld [vmem:[#allocation2 + $0x90] sm:$0xff]   ;;  %v1781_v12 = vld [vmem:[#allocation2 + $0x58] sm:$0xff]   ;;  %v1785_v16 = vld [vmem:[#allocation2 + $0x60] sm:$0xff]  }
  0x18   :  { %1531 = vmatprep.subr.bf16.mxu1 %v1774_v5  ;;  %v1782_v13 = vld [vmem:[#allocation2 + $0xd8] sm:$0xff]   ;;  %v1786_v17 = vld [vmem:[#allocation2 + $0xe0] sm:$0xff]   ;;  %v1789_v20 = vld [vmem:[#allocation2 + $0x68] sm:$0xff]  }
  0x19   :  { %v1783_v14 = vld [vmem:[#allocation2 + $0x18] sm:$0xff]   ;;  %v1787_v18 = vld [vmem:[#allocation2 + $0x20] sm:$0xff]   ;;  %v1790_v21 = vld [vmem:[#allocation2 + $0xe8] sm:$0xff]  }
  0x1a   :  { %1504 = vmatpush3.bf16.msra.mxu0 %v1775_v6  ;;  %v1784_v15 = vld [vmem:[#allocation2 + $0x98] sm:$0xff]   ;;  %v1788_v19 = vld [vmem:[#allocation2 + $0xa0] sm:$0xff]   ;;  %v1791_v22 = vld [vmem:[#allocation2 + $0x28] sm:$0xff]  }
  0x1b   :  { %1532 = vmatpush3.bf16.msra.mxu1 %v1776_v7  ;;  %1505 = vmatprep.subr.bf16.mxu0 %v1777_v8  ;;  %v1792_v23 = vld [vmem:[#allocation2 + $0xa8] sm:$0xff]   ;;  %v1793_v24 = vld [vmem:[#allocation2 + $0x70] sm:$0xff]   ;;  %v1797_v28 = vld [vmem:[#allocation2 + $0x78] sm:$0xff]  }
  0x1c   :  { %1533 = vmatprep.subr.bf16.mxu1 %v1778_v9  ;;  %v1794_v25 = vld [vmem:[#allocation2 + $0xf0] sm:$0xff]   ;;  %v1798_v29 = vld [vmem:[#allocation2 + $0xf8] sm:$0xff]   ;;  %v33_v32 = vld [vmem:[%s2191_s0] sm:$0xff] }
  0x1d   :  { %v1795_v26 = vld [vmem:[#allocation2 + $0x30] sm:$0xff]   ;;  %v1799_v30 = vld [vmem:[#allocation2 + $0x38] sm:$0xff]   ;;  %v37_v33 = vld [vmem:[%s2191_s0 + $0x20] sm:$0xff] }
  0x1e   :  { %1506 = vmatpush3.bf16.msra.mxu0 %v1779_v10  ;;  %v1796_v27 = vld [vmem:[#allocation2 + $0xb0] sm:$0xff]   ;;  %v1800_v31 = vld [vmem:[#allocation2 + $0xb8] sm:$0xff]   ;;  %v34_v34 = vld [vmem:[%s2191_s0 + $0x8] sm:$0xff]  ;;  %v1405_v35 = vcombine.low %v33_v32, %v37_v33  ;;  %v1406_v36 = vcombine.high %v33_v32, %v37_v33 }
  0x1f   :  { %1534 = vmatpush3.bf16.msra.mxu1 %v1780_v11  ;;  %1507 = vmatprep.subr.bf16.mxu0 %v1781_v12  ;;  %v38_v37 = vld [vmem:[%s2191_s0 + $0x28] sm:$0xff]  ;;  %v1801_v40 = vld [vmem:[#allocation2 + $0x140] sm:$0xff]   ;;  %v1809_v48 = vld [vmem:[#allocation2 + $0x150] sm:$0xff]  }
  0x20   :  { %1535 = vmatprep.subr.bf16.mxu1 %v1782_v13  ;;  %v1407_v38 = vcombine.low %v34_v34, %v38_v37  ;;  %v1408_v39 = vcombine.high %v34_v34, %v38_v37  ;;  %680 = vmatprep.mubr.bf16.mxu0 %v1406_v36  ;;  %v1802_v41 = vld [vmem:[#allocation2 + $0x1c0] sm:$0xff]   ;;  %v1805_v44 = vld [vmem:[#allocation2 + $0x148] sm:$0xff]   ;;  %v1810_v49 = vld [vmem:[#allocation2 + $0x1d0] sm:$0xff]  }
  0x21   :  { %v1803_v42 = vld [vmem:[#allocation2 + $0x100] sm:$0xff]   ;;  %v1806_v45 = vld [vmem:[#allocation2 + $0x1c8] sm:$0xff]   ;;  %v1811_v50 = vld [vmem:[#allocation2 + $0x110] sm:$0xff]  }
  0x22   :  { %1508 = vmatpush3.bf16.msra.mxu0 %v1783_v14  ;;  %729 = vmatprep.mubr.bf16.mxu1 %v1408_v39  ;;  %v1804_v43 = vld [vmem:[#allocation2 + $0x180] sm:$0xff]   ;;  %v1807_v46 = vld [vmem:[#allocation2 + $0x108] sm:$0xff]   ;;  %v1812_v51 = vld [vmem:[#allocation2 + $0x190] sm:$0xff]  }
  0x23   :  { %1536 = vmatpush3.bf16.msra.mxu1 %v1784_v15  ;;  %1509 = vmatprep.subr.bf16.mxu0 %v1785_v16  ;;  %v1808_v47 = vld [vmem:[#allocation2 + $0x188] sm:$0xff]   ;;  %v1813_v52 = vld [vmem:[#allocation2 + $0x158] sm:$0xff]   ;;  %v1817_v56 = vld [vmem:[#allocation2 + $0x160] sm:$0xff]  }
  0x24   :  { %1537 = vmatprep.subr.bf16.mxu1 %v1786_v17  ;;  %v1814_v53 = vld [vmem:[#allocation2 + $0x1d8] sm:$0xff]   ;;  %v1818_v57 = vld [vmem:[#allocation2 + $0x1e0] sm:$0xff]   ;;  %v1821_v63 = vld [vmem:[#allocation2 + $0x168] sm:$0xff]  }
  0x25   :  { %v1815_v54 = vld [vmem:[#allocation2 + $0x118] sm:$0xff]   ;;  %v1819_v58 = vld [vmem:[#allocation2 + $0x120] sm:$0xff]   ;;  %v1822_v1 = vld [vmem:[#allocation2 + $0x1e8] sm:$0xff]  }
  0x26   :  { %1510 = vmatpush3.bf16.msra.mxu0 %v1787_v18  ;;  %v1816_v55 = vld [vmem:[#allocation2 + $0x198] sm:$0xff]   ;;  %v1820_v59 = vld [vmem:[#allocation2 + $0x1a0] sm:$0xff]   ;;  %v1823_v2 = vld [vmem:[#allocation2 + $0x128] sm:$0xff]  }
  0x27   :  { %1538 = vmatpush3.bf16.msra.mxu1 %v1788_v19  ;;  %1511 = vmatprep.subr.bf16.mxu0 %v1789_v20  ;;  %v41_v60 = vld [vmem:[%s2191_s0 + $0x40] sm:$0xff]  ;;  %v1824_v3 = vld [vmem:[#allocation2 + $0x1a8] sm:$0xff]   ;;  %v1825_v8 = vld [vmem:[#allocation2 + $0x170] sm:$0xff]  }
  0x28   :  { %1539 = vmatprep.subr.bf16.mxu1 %v1790_v21  ;;  %v45_v61 = vld [vmem:[%s2191_s0 + $0x60] sm:$0xff]  ;;  %v42_v4 = vld [vmem:[%s2191_s0 + $0x48] sm:$0xff]  ;;  %v1826_v9 = vld [vmem:[#allocation2 + $0x1f0] sm:$0xff]  }
  0x29   :  { %v1414_v62 = vcombine.high %v41_v60, %v45_v61  ;;  %v1413_v0 = vcombine.low %v41_v60, %v45_v61  ;;  %v46_v5 = vld [vmem:[%s2191_s0 + $0x68] sm:$0xff]  ;;  %v1827_v10 = vld [vmem:[#allocation2 + $0x130] sm:$0xff]   ;;  %v1829_v12 = vld [vmem:[#allocation2 + $0x178] sm:$0xff]  }
  0x2a   :  { %1512 = vmatpush3.bf16.msra.mxu0 %v1791_v22  ;;  %v1416_v6 = vcombine.high %v42_v4, %v46_v5  ;;  %v1415_v7 = vcombine.low %v42_v4, %v46_v5  ;;  %v1828_v11 = vld [vmem:[#allocation2 + $0x1b0] sm:$0xff]   ;;  %v1830_v13 = vld [vmem:[#allocation2 + $0x1f8] sm:$0xff]   ;;  %v848_v32 = vld [vmem:[%s2194_s3] sm:$0xff] }
  0x2b   :  { %1540 = vmatpush3.bf16.msra.mxu1 %v1792_v23  ;;  %1513 = vmatprep.subr.bf16.mxu0 %v1793_v24  ;;  %v1831_v14 = vld [vmem:[#allocation2 + $0x138] sm:$0xff]   ;;  %v35_v16 = vld [vmem:[%s2191_s0 + $0x10] sm:$0xff]  ;;  %v865_v34 = vsel %vm864_vm0, %v848_v32, 0.0  ;;  %v2027_v36 = vld [vmem:[%s2194_s3 + $0x8] sm:$0xff] }
  0x2c   :  { %1541 = vmatprep.subr.bf16.mxu1 %v1794_v25  ;;  %v1832_v15 = vld [vmem:[#allocation2 + $0x1b8] sm:$0xff]   ;;  %v39_v17 = vld [vmem:[%s2191_s0 + $0x30] sm:$0xff]  ;;  %866 = vadd.xlane.f32.xlu0 %v865_v34 }
  0x2d   :  { %v36_v18 = vld [vmem:[%s2191_s0 + $0x18] sm:$0xff]  ;;  %v1409_v20 = vcombine.low %v35_v16, %v39_v17  ;;  %v1410_v21 = vcombine.high %v35_v16, %v39_v17  ;;  %v43_v24 = vld [vmem:[%s2191_s0 + $0x50] sm:$0xff] }
  0x2e   :  { %1514 = vmatpush3.bf16.msra.mxu0 %v1795_v26  ;;  %v40_v19 = vld [vmem:[%s2191_s0 + $0x38] sm:$0xff]  ;;  %v47_v25 = vld [vmem:[%s2191_s0 + $0x70] sm:$0xff] }
  0x2f   :  { %1542 = vmatpush3.bf16.msra.mxu1 %v1796_v27  ;;  %1515 = vmatprep.subr.bf16.mxu0 %v1797_v28  ;;  %v1411_v22 = vcombine.low %v36_v18, %v40_v19  ;;  %v1412_v23 = vcombine.high %v36_v18, %v40_v19  ;;  %v44_v26 = vld [vmem:[%s2191_s0 + $0x58] sm:$0xff]  ;;  %v1418_v27 = vcombine.high %v43_v24, %v47_v25  ;;  %v2019_v33 = vld [vmem:[%s2194_s3 + $0x10] sm:$0xff] }
  0x30   :  { %1543 = vmatprep.subr.bf16.mxu1 %v1798_v29  ;;  %v48_v28 = vld [vmem:[%s2191_s0 + $0x78] sm:$0xff]  ;;  %v2111_v60 = vld [vmem:[%s2194_s3 + $0x70] sm:$0xff] }
  0x31   :  { %v1420_v29 = vcombine.high %v44_v26, %v48_v28  ;;  %v2032_v37 = vld [vmem:[%s2194_s3 + $0x18] sm:$0xff] }
  0x32   :  { %1516 = vmatpush3.bf16.msra.mxu0 %v1799_v30  ;;  %v1417_v30 = vcombine.low %v43_v24, %v47_v25  ;;  %v874_v39 = vsel %vm864_vm0, %v2032_v37, 0.0  ;;  %v2116_v61 = vld [vmem:[%s2194_s3 + $0x78] sm:$0xff] }
  0x33   :  { %1544 = vmatpush3.bf16.msra.mxu1 %v1800_v31  ;;  %1557 = vmatprep.subr.bf16.mxu0 %v1801_v40  ;;  %v1419_v31 = vcombine.low %v44_v26, %v48_v28  ;;  %v2041_v40 = vld [vmem:[%s2194_s3 + $0x20] sm:$0xff] }
  0x34   :  { %1585 = vmatprep.subr.bf16.mxu1 %v1802_v41  ;;  %v2046_v41 = vld [vmem:[%s2194_s3 + $0x28] sm:$0xff] }
  0x35   :  { %681 = vmatmul.mubr.bf16.vlgmr.msra.gmra.mrb[0].mxu0 %v1405_v35  ;;  %v871_v35 = vsel %vm864_vm0, %v2019_v33, 0.0 }
  0x36   :  { %730 = vmatmul.mubr.bf16.vlgmr.msra.gmra.mrb[0].mxu1 %v1407_v38  ;;  %1558 = vmatpush3.bf16.msra.mxu0 %v1803_v42  ;;  %v868_v38 = vsel %vm864_vm0, %v2027_v36, 0.0  ;;  %v880_v42 = vsel %vm864_vm0, %v2046_v41, 0.0 }
  0x37   :  { %1586 = vmatpush3.bf16.msra.mxu1 %v1804_v43  ;;  %1559 = vmatprep.subr.bf16.mxu0 %v1805_v44  ;;  %v877_v43 = vsel %vm864_vm0, %v2041_v40, 0.0  ;;  %v2055_v44 = vld [vmem:[%s2194_s3 + $0x30] sm:$0xff] }
  0x38   :  { %1587 = vmatprep.subr.bf16.mxu1 %v1806_v45  ;;  %688 = vmatprep.mubr.bf16.mxu0 %v1414_v62  ;;  %v2060_v45 = vld [vmem:[%s2194_s3 + $0x38] sm:$0xff]  ;;  %v910_v62 = vsel %vm864_vm0, %v2116_v61, 0.0 }
  0x39   :  { %737 = vmatprep.mubr.bf16.mxu1 %v1416_v6  ;;  %872 = vadd.xlane.f32.xlu1 %v871_v35 }
  0x3a   :  { %1560 = vmatpush3.bf16.msra.mxu0 %v1807_v46  ;;  %869 = vadd.xlane.f32.xlu0 %v868_v38  ;;  %v886_v46 = vsel %vm864_vm0, %v2060_v45, 0.0 }
  0x3b   :  { %1588 = vmatpush3.bf16.msra.mxu1 %v1808_v47  ;;  %1561 = vmatprep.subr.bf16.mxu0 %v1809_v48  ;;  %v883_v47 = vsel %vm864_vm0, %v2055_v44, 0.0  ;;  %v2069_v48 = vld [vmem:[%s2194_s3 + $0x40] sm:$0xff] }
  0x3c   :  { %1589 = vmatprep.subr.bf16.mxu1 %v1810_v49  ;;  %v2074_v49 = vld [vmem:[%s2194_s3 + $0x48] sm:$0xff] }
  0x3d   :  { %689 = vmatmul.mubr.bf16.gmra.mrb[4].mxu0 %v1413_v0  ;;  %875 = vadd.xlane.f32.xlu1 %v874_v39 }
  0x3e   :  { %1562 = vmatpush3.bf16.msra.mxu0 %v1811_v50  ;;  %738 = vmatmul.mubr.bf16.gmra.mrb[4].mxu1 %v1415_v7  ;;  %v892_v50 = vsel %vm864_vm0, %v2074_v49, 0.0 }
  0x3f   :  { %1590 = vmatpush3.bf16.msra.mxu1 %v1812_v51  ;;  %1563 = vmatprep.subr.bf16.mxu0 %v1813_v52  ;;  %v889_v51 = vsel %vm864_vm0, %v2069_v48, 0.0  ;;  %v2083_v52 = vld [vmem:[%s2194_s3 + $0x50] sm:$0xff] }
  0x40   :  { %1591 = vmatprep.subr.bf16.mxu1 %v1814_v53  ;;  %778 = vmatprep.mubr.bf16.mxu0 %v1410_v21  ;;  %v2088_v53 = vld [vmem:[%s2194_s3 + $0x58] sm:$0xff] }
  0x41   :  { %827 = vmatprep.mubr.bf16.mxu1 %v1412_v23  ;;  %881 = vadd.xlane.f32.xlu1 %v880_v42 }
  0x42   :  { %1564 = vmatpush3.bf16.msra.mxu0 %v1815_v54  ;;  %878 = vadd.xlane.f32.xlu0 %v877_v43  ;;  %v898_v54 = vsel %vm864_vm0, %v2088_v53, 0.0 }
  0x43   :  { %1592 = vmatpush3.bf16.msra.mxu1 %v1816_v55  ;;  %1565 = vmatprep.subr.bf16.mxu0 %v1817_v56  ;;  %v895_v55 = vsel %vm864_vm0, %v2083_v52, 0.0  ;;  %v2097_v56 = vld [vmem:[%s2194_s3 + $0x60] sm:$0xff] }
  0x44   :  { %1593 = vmatprep.subr.bf16.mxu1 %v1818_v57  ;;  %v2102_v57 = vld [vmem:[%s2194_s3 + $0x68] sm:$0xff] }
  0x45   :  { %887 = vadd.xlane.f32.xlu1 %v886_v46 }
  0x46   :  { %1566 = vmatpush3.bf16.msra.mxu0 %v1819_v58  ;;  %884 = vadd.xlane.f32.xlu0 %v883_v47  ;;  %v904_v58 = vsel %vm864_vm0, %v2102_v57, 0.0 }
  0x47   :  { %1594 = vmatpush3.bf16.msra.mxu1 %v1820_v59  ;;  %1567 = vmatprep.subr.bf16.mxu0 %v1821_v63  ;;  %v901_v59 = vsel %vm864_vm0, %v2097_v56, 0.0  ;;  %v907_v63 = vsel %vm864_vm0, %v2111_v60, 0.0 }
  0x48   :  { %1595 = vmatprep.subr.bf16.mxu1 %v1822_v1 }
  0x49   :  { %893 = vadd.xlane.f32.xlu1 %v892_v50 }
  0x4a   :  { %1568 = vmatpush3.bf16.msra.mxu0 %v1823_v2  ;;  %890 = vadd.xlane.f32.xlu0 %v889_v51  ;;  %v1404_v2 = vld [vmem:[%s2193_s2] ss:$0 sm:$0xff]  ;;  %s1924_s2 = smov [#allocation5]  }
  0x4b   :  { %1596 = vmatpush3.bf16.msra.mxu1 %v1824_v3  ;;  %1569 = vmatprep.subr.bf16.mxu0 %v1825_v8  ;;  %s1392_s3 = sshll.u32 %s1924_s2, 4  ;;  %s1393_s3 = int_to_ptr.vmem [resolvable:$true] %s1392_s3 }
  0x4c   :  { %1597 = vmatprep.subr.bf16.mxu1 %v1826_v9  ;;  %s1895_s12 = scalar_lea.vmem %s1393_s3, 512  ;;  %p1900_p9 = scmp.lt.s32.totalorder %s1393_s3, %s1393_s3 }
  0x4d   :  { %899 = vadd.xlane.f32.xlu1 %v898_v54  ;;  %p1896_p8 = scmp.ne.s32.totalorder %s1393_s3, %s1895_s12  ;;  %p1901_p10 = scmp.lt.s32.totalorder %s1895_s12, %s1895_s12 }
  0x4e   :  { %1570 = vmatpush3.bf16.msra.mxu0 %v1827_v10  ;;  %896 = vadd.xlane.f32.xlu0 %v895_v55 }
  0x4f   :  { %1598 = vmatpush3.bf16.msra.mxu1 %v1828_v11  ;;  %1571 = vmatprep.subr.bf16.mxu0 %v1829_v12  ;;  %p1902_p11 = por %p1901_p10, %p1900_p9 }
  0x50   :  { %1599 = vmatprep.subr.bf16.mxu1 %v1830_v13 }
  0x51   :  { %905 = vadd.xlane.f32.xlu1 %v904_v58  ;;  %p1903_p12 = pnand %p1902_p11, %p1896_p8 }
  0x52   :  { %1572 = vmatpush3.bf16.msra.mxu0 %v1831_v14  ;;  %902 = vadd.xlane.f32.xlu0 %v901_v59 }
  0x53   :  { %1600 = vmatpush3.bf16.msra.mxu1 %v1832_v15 }
  0x55   :  { %779 = vmatmul.mubr.bf16.vlgmr.msra.gmra.mrb[8].mxu0 %v1409_v20  ;;  %911 = vadd.xlane.f32.xlu1 %v910_v62 }
  0x56   :  { %828 = vmatmul.mubr.bf16.vlgmr.msra.gmra.mrb[8].mxu1 %v1411_v22  ;;  %786 = vmatprep.mubr.bf16.mxu0 %v1418_v27 }
  0x57   :  { %835 = vmatprep.mubr.bf16.mxu1 %v1420_v29  ;;  %908 = vadd.xlane.f32.xlu0 %v907_v63 }
  0x5d   :  { %787 = vmatmul.mubr.bf16.gmra.mrb[12].mxu0 %v1417_v30 }
  0x5e   :  { %836 = vmatmul.mubr.bf16.gmra.mrb[12].mxu1 %v1419_v31  ;;  %1661 = vmatprep.mubr.msk.f32.mxu0 %vm864_vm0, %v848_v32 }
 0x108   :  { %v1517_v0 = vpop.f32.mrb[0].mxu0 }
 0x109   :  { %v1545_v1 = vpop.f32.mrb[0].mxu1  ;;  %v1518_v3 = vpop.f32.mrb[1].mxu0 }
 0x10a   :  { %v1519_v4 = vadd.f32 %v1518_v3, %v1517_v0  ;;  %v1546_v5 = vpop.f32.mrb[1].mxu1  ;;  %v1520_v6 = vpop.f32.mrb[2].mxu0 }
 0x10b   :  { %v1547_v7 = vadd.f32 %v1546_v5, %v1545_v1  ;;  %v1548_v8 = vpop.f32.mrb[2].mxu1  ;;  %v1521_v9 = vpop.f32.mrb[3].mxu0 }
 0x10c   :  { %v683_v10 = vadd.f32 %v1519_v4, %v1404_v2  ;;  %v1522_v11 = vadd.f32 %v1521_v9, %v1520_v6  ;;  %v1549_v12 = vpop.f32.mrb[3].mxu1 }
 0x10d   :  { %v1550_v13 = vadd.f32 %v1549_v12, %v1548_v8 }
 0x10e   :  { %v732_v14 = vadd.f32 %v1547_v7, %v683_v10  ;;  %v686_v15 = vadd.f32 %v1522_v11, %v1404_v2 }
 0x110   :  { %v735_v16 = vadd.f32 %v1550_v13, %v686_v15  ;;  %v1523_v17 = vpop.f32.mrb[4].mxu0 }
 0x111   :  { %v1524_v18 = vpop.f32.mrb[5].mxu0  ;;  %v1551_v24 = vpop.f32.mrb[4].mxu1 }
 0x112   :  { %v1525_v19 = vadd.f32 %v1524_v18, %v1523_v17  ;;  %v1526_v20 = vpop.f32.mrb[6].mxu0  ;;  %v1552_v25 = vpop.f32.mrb[5].mxu1 }
 0x113   :  { %v1527_v21 = vpop.f32.mrb[7].mxu0  ;;  %v1553_v27 = vadd.f32 %v1552_v25, %v1551_v24  ;;  %v1554_v28 = vpop.f32.mrb[6].mxu1 }
 0x114   :  { %v1528_v22 = vadd.f32 %v1527_v21, %v1526_v20  ;;  %v691_v23 = vadd.f32 %v1525_v19, %v1404_v2  ;;  %v1555_v29 = vpop.f32.mrb[7].mxu1 }
 0x115   :  { %v1556_v31 = vadd.f32 %v1555_v29, %v1554_v28 }
 0x116   :  { %v694_v26 = vadd.f32 %v1528_v22, %v1404_v2  ;;  %v740_v30 = vadd.f32 %v1553_v27, %v691_v23 }
 0x118   :  { %v743_v32 = vadd.f32 %v1556_v31, %v694_v26 }
 0x128   :  { %v1573_v34 = vpop.f32.mrb[8].mxu0 }
 0x129   :  { %v1601_v35 = vpop.f32.mrb[8].mxu1  ;;  %v1574_v38 = vpop.f32.mrb[9].mxu0 }
 0x12a   :  { %v1602_v39 = vpop.f32.mrb[9].mxu1  ;;  %v1575_v42 = vadd.f32 %v1574_v38, %v1573_v34  ;;  %v1576_v46 = vpop.f32.mrb[10].mxu0 }
 0x12b   :  { %v1603_v43 = vadd.f32 %v1602_v39, %v1601_v35  ;;  %v1604_v47 = vpop.f32.mrb[10].mxu1  ;;  %v1577_v50 = vpop.f32.mrb[11].mxu0 }
 0x12c   :  { %v1605_v51 = vpop.f32.mrb[11].mxu1  ;;  %v781_v54 = vadd.f32 %v1575_v42, %v732_v14  ;;  %v1578_v55 = vadd.f32 %v1577_v50, %v1576_v46 }
 0x12d   :  { %v1606_v58 = vadd.f32 %v1605_v51, %v1604_v47 }
 0x12e   :  { %v830_v59 = vadd.f32 %v1603_v43, %v781_v54  ;;  %v784_v62 = vadd.f32 %v1578_v55, %v735_v16 }
 0x130   :  { %v2125_v63 = vmax.f32 %v830_v59, 0.0  ;;  %v833_v0 = vadd.f32 %v1606_v58, %v784_v62  ;;  %v1579_v1 = vpop.f32.mrb[12].mxu0 }
 0x131   :  { %v1607_v2 = vpop.f32.mrb[12].mxu1  ;;  %v1580_v3 = vpop.f32.mrb[13].mxu0 }
 0x132   :  { %v1608_v4 = vpop.f32.mrb[13].mxu1  ;;  %v2127_v5 = vmax.f32 %v833_v0, 0.0  ;;  %v1581_v6 = vadd.f32 %v1580_v3, %v1579_v1  ;;  %v1582_v8 = vpop.f32.mrb[14].mxu0  ;;  %1717 = vmatprep.mubr.f32.mxu1 %v2125_v63 }
 0x133   :  { %v1609_v7 = vadd.f32 %v1608_v4, %v1607_v2  ;;  %v1610_v9 = vpop.f32.mrb[14].mxu1  ;;  %v1583_v10 = vpop.f32.mrb[15].mxu0 }
 0x134   :  { %v1611_v11 = vpop.f32.mrb[15].mxu1  ;;  %v789_v12 = vadd.f32 %v1581_v6, %v740_v30  ;;  %v1584_v13 = vadd.f32 %v1583_v10, %v1582_v8  ;;  %v1723_v15 = vpack.c.bf16 %v2127_v5, %v2125_v63 }
 0x135   :  { %v1612_v14 = vadd.f32 %v1611_v11, %v1610_v9 }
 0x136   :  { %v838_v16 = vadd.f32 %v1609_v7, %v789_v12  ;;  %v792_v17 = vadd.f32 %v1584_v13, %v743_v32  ;;  %1724 = vmatprep.subr.bf16.mxu0 %v1723_v15 }
 0x137   :  { %1726 = vmatpush3.bf16.msra.mxu0 %v1723_v15 }
 0x138   :  { %v841_v18 = vadd.f32 %v1612_v14, %v792_v17  ;;  %v2132_v19 = vmax.f32 %v838_v16, 0.0 }
 0x13a   :  { %v2134_v20 = vmax.f32 %v841_v18, 0.0 }
 0x13c   :  { %v1727_v21 = vpack.c.bf16 %v2134_v20, %v2132_v19 }
 0x13e   :  { %1728 = vmatprep.subr.bf16.mxu0 %v1727_v21 }
 0x13f   :  { %1730 = vmatpush3.bf16.msra.mxu0 %v1727_v21 }
 0x142   :  { %1662 = vmatmul.mubr.msk.f32.vlgmr.msra.gmra.mrb[16].mxu0 %vm864_vm0, %v2027_v36  ;;  %v867_v36 = vpop.xlane.xlu0 %866 }
 0x143   :  { %1664 = vmatprep.mubr.msk.f32.mxu0 %vm864_vm0, %v2019_v33  ;;  %v873_v33 = vpop.xlane.xlu1 %872 }
 0x146   :  { %1665 = vmatmul.mubr.msk.f32.gmra.mrb[18].mxu0 %vm864_vm0, %v2032_v37 }
 0x147   :  { %1667 = vmatprep.mubr.msk.f32.mxu0 %vm864_vm0, %v2041_v40  ;;  %v876_v37 = vpop.xlane.xlu1 %875  ;;  %v870_v40 = vpop.xlane.xlu0 %869 }
 0x14a   :  { %1668 = vmatmul.mubr.msk.f32.gmra.mrb[20].mxu0 %vm864_vm0, %v2046_v41 }
 0x14b   :  { %1670 = vmatprep.mubr.msk.f32.mxu0 %vm864_vm0, %v2055_v44  ;;  %v882_v41 = vpop.xlane.xlu1 %881  ;;  %v879_v44 = vpop.xlane.xlu0 %878 }
 0x14c   :  { %v917_v22 = vmax.f32 %v879_v44, 1.0 }
 0x14e   :  { %1671 = vmatmul.mubr.msk.f32.gmra.mrb[22].mxu0 %vm864_vm0, %v2060_v45  ;;  %v914_v45 = vmax.f32 %v870_v40, 1.0 }
 0x14f   :  { %1673 = vmatprep.mubr.msk.f32.mxu0 %vm864_vm0, %v2069_v48  ;;  %v888_v48 = vpop.xlane.xlu1 %887 }
 0x150   :  { %1833 = vrcp.f32 %v914_v45  ;;  %v920_v23 = vmax.f32 %v888_v48, 1.0 }
 0x152   :  { %1674 = vmatmul.mubr.msk.f32.gmra.mrb[24].mxu0 %vm864_vm0, %v2074_v49  ;;  %v913_v49 = vmax.f32 %v867_v36, 1.0 }
 0x153   :  { %1676 = vmatprep.mubr.msk.f32.mxu0 %vm864_vm0, %v2083_v52  ;;  %v916_v52 = vmax.f32 %v876_v37, 1.0 }
 0x154   :  { %1835 = vrcp.f32 %v913_v49 }
 0x155   :  { %1837 = vrcp.f32 %v916_v52 }
 0x156   :  { %1677 = vmatmul.mubr.msk.f32.gmra.mrb[26].mxu0 %vm864_vm0, %v2088_v53  ;;  %v885_v53 = vpop.xlane.xlu0 %884 }
 0x157   :  { %1679 = vmatprep.mubr.msk.f32.mxu0 %vm864_vm0, %v2097_v56  ;;  %v915_v56 = vmax.f32 %v873_v33, 1.0  ;;  %v919_v24 = vmax.f32 %v885_v53, 1.0 }
 0x159   :  { %1839 = vrcp.f32 %v915_v56 }
 0x15a   :  { %1680 = vmatmul.mubr.msk.f32.gmra.mrb[28].mxu0 %vm864_vm0, %v2102_v57  ;;  %v894_v57 = vpop.xlane.xlu1 %893  ;;  %v1834_v26 = vpop.eup %1833 }
 0x15b   :  { %1682 = vmatprep.mubr.msk.f32.mxu0 %vm864_vm0, %v2111_v60  ;;  %v918_v60 = vmax.f32 %v882_v41, 1.0  ;;  %v922_v28 = vmax.f32 %v894_v57, 1.0 }
 0x15d   :  { %1841 = vrcp.f32 %v918_v60 }
 0x15e   :  { %1683 = vmatmul.mubr.msk.f32.gmra.mrb[30].mxu0 %vm864_vm0, %v2116_v61  ;;  %v891_v61 = vpop.xlane.xlu0 %890  ;;  %1843 = vrcp.f32 %v917_v22  ;;  %v900_v25 = vpop.xlane.xlu1 %899 }
 0x15f   :  { %1845 = vrcp.f32 %v920_v23  ;;  %v1836_v30 = vpop.eup %1835  ;;  %v921_v34 = vmax.f32 %v891_v61, 1.0  ;;  %v924_v51 = vmax.f32 %v900_v25, 1.0 }
 0x160   :  { %1847 = vrcp.f32 %v919_v24  ;;  %v1838_v35 = vpop.eup %1837 }
 0x161   :  { %1849 = vrcp.f32 %v922_v28 }
 0x162   :  { %v897_v29 = vpop.xlane.xlu0 %896  ;;  %v906_v43 = vpop.xlane.xlu1 %905  ;;  %1851 = vrcp.f32 %v921_v34 }
 0x163   :  { %v1840_v39 = vpop.eup %1839  ;;  %v923_v58 = vmax.f32 %v897_v29, 1.0  ;;  %1853 = vrcp.f32 %v924_v51  ;;  %v926_v7 = vmax.f32 %v906_v43, 1.0 }
 0x165   :  { %1855 = vrcp.f32 %v923_v58 }
 0x166   :  { %v903_v0 = vpop.xlane.xlu0 %902  ;;  %v912_v11 = vpop.xlane.xlu1 %911  ;;  %1857 = vrcp.f32 %v926_v7  ;;  %v1157_v7 = vmul.f32 %v2134_v20, %v2134_v20 }
 0x167   :  { %v1842_v59 = vpop.eup %1841  ;;  %v925_v10 = vmax.f32 %v903_v0, 1.0  ;;  %v928_v33 = vmax.f32 %v912_v11, 1.0 }
 0x168   :  { %v1844_v1 = vpop.eup %1843 }
 0x169   :  { %v1846_v12 = vpop.eup %1845  ;;  %1859 = vrcp.f32 %v925_v10 }
 0x16a   :  { %v909_v14 = vpop.xlane.xlu0 %908  ;;  %v1848_v15 = vpop.eup %1847  ;;  %1861 = vrcp.f32 %v928_v33 }
 0x16b   :  { %v927_v40 = vmax.f32 %v909_v14, 1.0  ;;  %v1850_v41 = vpop.eup %1849 }
 0x16c   :  { %v1852_v45 = vpop.eup %1851 }
 0x16d   :  { %1863 = vrcp.f32 %v927_v40  ;;  %v1854_v60 = vpop.eup %1853 }
 0x16f   :  { %v1856_v61 = vpop.eup %1855 }
 0x170   :  { %v1858_v29 = vpop.eup %1857 }
 0x215   :  { %v1663_v27 = vpop.f32.mrb[16].mxu0 }
 0x216   :  { %v1139_v31 = vmul.f32 %v1834_v26, %v1663_v27  ;;  %v1059_v32 = vpop.f32.mrb[17].mxu0 }
 0x217   :  { %v1138_v38 = vmul.f32 %v1836_v30, %v1059_v32 }
 0x218   :  { %v1167_v42 = vmul.f32 %v1139_v31, %v1139_v31 }
 0x219   :  { %v1731_v46 = vpack.c.bf16 %v1139_v31, %v1138_v38  ;;  %v1666_v47 = vpop.f32.mrb[18].mxu0  ;;  %v1166_v50 = vmul.f32 %v1138_v38, %v1138_v38  ;;  %v1860_v31 = vpop.eup %1859 }
 0x21a   :  { %v1141_v54 = vmul.f32 %v1838_v35, %v1666_v47  ;;  %1184 = vadd.xlane.f32.xlu1 %v1167_v42  ;;  %v1069_v55 = vpop.f32.mrb[19].mxu0  ;;  %v1862_v43 = vpop.eup %1861 }
 0x21b   :  { %v1140_v62 = vmul.f32 %v1840_v39, %v1069_v55  ;;  %1732 = vmatprep.subr.bf16.mxu1 %v1731_v46  ;;  %1182 = vadd.xlane.f32.xlu0 %v1166_v50  ;;  %v1864_v47 = vpop.eup %1863 }
 0x21c   :  { %1734 = vmatpush3.bf16.xpose.msra.mxu1 %v1731_v46  ;;  %v1169_v2 = vmul.f32 %v1141_v54, %v1141_v54 }
 0x21d   :  { %v1735_v3 = vpack.c.bf16 %v1141_v54, %v1140_v62  ;;  %v1669_v4 = vpop.f32.mrb[20].mxu0  ;;  %v1168_v6 = vmul.f32 %v1140_v62, %v1140_v62 }
 0x21e   :  { %v1143_v8 = vmul.f32 %v1842_v59, %v1669_v4  ;;  %1188 = vadd.xlane.f32.xlu1 %v1169_v2  ;;  %v1079_v9 = vpop.f32.mrb[21].mxu0  ;;  %v1156_v4 = vmul.f32 %v2132_v19, %v2132_v19 }
 0x21f   :  { %v1142_v13 = vmul.f32 %v1844_v1, %v1079_v9  ;;  %1186 = vadd.xlane.f32.xlu0 %v1168_v6  ;;  %1736 = vmatprep.subr.bf16.mxu1 %v1735_v3  ;;  %v1154_v1 = vmul.f32 %v2125_v63, %v2125_v63 }
 0x220   :  { %v1171_v16 = vmul.f32 %v1143_v8, %v1143_v8 }
 0x221   :  { %v1739_v17 = vpack.c.bf16 %v1143_v8, %v1142_v13  ;;  %v1672_v18 = vpop.f32.mrb[22].mxu0  ;;  %v1170_v21 = vmul.f32 %v1142_v13, %v1142_v13 }
 0x222   :  { %v1145_v36 = vmul.f32 %v1846_v12, %v1672_v18  ;;  %1192 = vadd.xlane.f32.xlu1 %v1171_v16  ;;  %v1089_v37 = vpop.f32.mrb[23].mxu0 }
 0x223   :  { %v1144_v44 = vmul.f32 %v1848_v15, %v1089_v37  ;;  %1190 = vadd.xlane.f32.xlu0 %v1170_v21  ;;  %v1331_v37 = vlaneseq }
 0x224   :  { %1738 = vmatpush3.bf16.xpose.msra.mxu1 %v1735_v3  ;;  %v1173_v48 = vmul.f32 %v1145_v36, %v1145_v36  ;;  %v1155_v3 = vmul.f32 %v2127_v5, %v2127_v5 }
 0x225   :  { %v1743_v49 = vpack.c.bf16 %v1145_v36, %v1144_v44  ;;  %v1675_v52 = vpop.f32.mrb[24].mxu0  ;;  %v1172_v53 = vmul.f32 %v1144_v44, %v1144_v44  ;;  %1740 = vmatprep.subr.bf16.mxu1 %v1739_v17  ;;  %v1332_v40 = vshrl.u32 %v1331_v37, 7 }
 0x226   :  { %v1147_v56 = vmul.f32 %v1850_v41, %v1675_v52  ;;  %1196 = vadd.xlane.f32.xlu1 %v1173_v48  ;;  %v1099_v57 = vpop.f32.mrb[25].mxu0 }
 0x227   :  { %v1146_v22 = vmul.f32 %v1852_v45, %v1099_v57  ;;  %1194 = vadd.xlane.f32.xlu0 %v1172_v53  ;;  %v1333_v41 = vsub.s32 0, %v1332_v40 }
 0x228   :  { %v1175_v23 = vmul.f32 %v1147_v56, %v1147_v56 }
 0x229   :  { %v1747_v24 = vpack.c.bf16 %v1147_v56, %v1146_v22  ;;  %v1678_v25 = vpop.f32.mrb[26].mxu0  ;;  %v1174_v26 = vmul.f32 %v1146_v22, %v1146_v22 }
 0x22a   :  { %v1149_v27 = vmul.f32 %v1854_v60, %v1678_v25  ;;  %1200 = vadd.xlane.f32.xlu1 %v1175_v23  ;;  %v1109_v28 = vpop.f32.mrb[27].mxu0 }
 0x22b   :  { %v1148_v30 = vmul.f32 %v1856_v61, %v1109_v28  ;;  %1198 = vadd.xlane.f32.xlu0 %v1174_v26 }
 0x22c   :  { %1742 = vmatpush3.bf16.xpose.msra.mxu1 %v1739_v17  ;;  %v1177_v32 = vmul.f32 %v1149_v27, %v1149_v27 }
 0x22d   :  { %v1751_v34 = vpack.c.bf16 %v1149_v27, %v1148_v30  ;;  %v1681_v35 = vpop.f32.mrb[28].mxu0  ;;  %v1176_v38 = vmul.f32 %v1148_v30, %v1148_v30  ;;  %1744 = vmatprep.subr.bf16.mxu1 %v1743_v49 }
 0x22e   :  { %v1151_v39 = vmul.f32 %v1858_v29, %v1681_v35  ;;  %1204 = vadd.xlane.f32.xlu1 %v1177_v32  ;;  %v1119_v42 = vpop.f32.mrb[29].mxu0 }
 0x22f   :  { %v1150_v46 = vmul.f32 %v1860_v31, %v1119_v42  ;;  %1202 = vadd.xlane.f32.xlu0 %v1176_v38 }
 0x230   :  { %v1179_v50 = vmul.f32 %v1151_v39, %v1151_v39 }
 0x231   :  { %v1755_v51 = vpack.c.bf16 %v1151_v39, %v1150_v46  ;;  %v1684_v54 = vpop.f32.mrb[30].mxu0  ;;  %v1178_v55 = vmul.f32 %v1150_v46, %v1150_v46 }
 0x232   :  { %v1153_v58 = vmul.f32 %v1862_v43, %v1684_v54  ;;  %1208 = vadd.xlane.f32.xlu1 %v1179_v50  ;;  %v1129_v59 = vpop.f32.mrb[31].mxu0 }
 0x233   :  { %1206 = vadd.xlane.f32.xlu0 %v1178_v55  ;;  %v1152_v62 = vmul.f32 %v1864_v47, %v1129_v59 }
 0x234   :  { %1746 = vmatpush3.bf16.xpose.msra.mxu1 %v1743_v49  ;;  %v1181_v0 = vmul.f32 %v1153_v58, %v1153_v58 }
 0x235   :  { %1748 = vmatprep.subr.bf16.mxu1 %v1747_v24  ;;  %v1759_v2 = vpack.c.bf16 %v1153_v58, %v1152_v62  ;;  %v1180_v6 = vmul.f32 %v1152_v62, %v1152_v62 }
 0x236   :  { %1212 = vadd.xlane.f32.xlu1 %v1181_v0 }
 0x237   :  { %1158 = vadd.xlane.f32.xlu0 %v1154_v1 }
 0x23a   :  { %1160 = vadd.xlane.f32.xlu1 %v1155_v3 }
 0x23b   :  { %1162 = vadd.xlane.f32.xlu0 %v1156_v4 }
 0x23c   :  { %1750 = vmatpush3.bf16.xpose.msra.mxu1 %v1747_v24 }
 0x23d   :  { %1752 = vmatprep.subr.bf16.mxu1 %v1751_v34 }
 0x23e   :  { %1164 = vadd.xlane.f32.xlu1 %v1157_v7 }
 0x23f   :  { %1210 = vadd.xlane.f32.xlu0 %v1180_v6 }
 0x244   :  { %1754 = vmatpush3.bf16.xpose.msra.mxu1 %v1751_v34 }
 0x245   :  { %1756 = vmatprep.subr.bf16.mxu1 %v1755_v51 }
 0x24c   :  { %1758 = vmatpush3.bf16.xpose.msra.mxu1 %v1755_v51 }
 0x24d   :  { %1760 = vmatprep.subr.bf16.mxu1 %v1759_v2 }
 0x254   :  { %1762 = vmatpush3.bf16.xpose.msra.mxu1 %v1759_v2 }
 0x25b   :  { %1718 = vmatmul.mubr.f32.vlgmr.msra.gmra.mrb[16].mxu1 %v2127_v5 }
 0x25c   :  { %1720 = vmatprep.mubr.f32.mxu1 %v2132_v19 }
 0x25f   :  { %1721 = vmatmul.mubr.f32.gmra.mrb[18].mxu1 %v2134_v20 }
 0x2a7   :  { %v1185_v8 = vpop.xlane.xlu1 %1184 }
 0x2a8   :  { %v1183_v63 = vpop.xlane.xlu0 %1182 }
 0x2a9   :  { %1299 = vxpose.xlu0.b32.start [1/16] (narrow) %v1183_v63, 8 }
 0x2ab   :  { %v1189_v10 = vpop.xlane.xlu1 %1188 }
 0x2ac   :  { %v1187_v9 = vpop.xlane.xlu0 %1186 }
 0x2ad   :  { %1300 = vxpose.xlu0.b32.cont [2/16] (narrow) %v1185_v8, 8 }
 0x2af   :  { %v1193_v12 = vpop.xlane.xlu1 %1192 }
 0x2b0   :  { %v1191_v11 = vpop.xlane.xlu0 %1190 }
 0x2b1   :  { %1301 = vxpose.xlu0.b32.cont [3/16] (narrow) %v1187_v9, 8 }
 0x2b3   :  { %v1197_v5 = vpop.xlane.xlu1 %1196 }
 0x2b4   :  { %v1195_v13 = vpop.xlane.xlu0 %1194 }
 0x2b5   :  { %1302 = vxpose.xlu0.b32.cont [4/16] (narrow) %v1189_v10, 8 }
 0x2b7   :  { %v1201_v20 = vpop.xlane.xlu1 %1200 }
 0x2b8   :  { %v1199_v14 = vpop.xlane.xlu0 %1198 }
 0x2b9   :  { %1303 = vxpose.xlu0.b32.cont [5/16] (narrow) %v1191_v11, 8 }
 0x2bb   :  { %v1205_v16 = vpop.xlane.xlu1 %1204 }
 0x2bc   :  { %v1203_v19 = vpop.xlane.xlu0 %1202 }
 0x2bd   :  { %1304 = vxpose.xlu0.b32.cont [6/16] (narrow) %v1193_v12, 8 }
 0x2bf   :  { %v1209_v21 = vpop.xlane.xlu1 %1208 }
 0x2c0   :  { %v1207_v15 = vpop.xlane.xlu0 %1206 }
 0x2c1   :  { %1305 = vxpose.xlu0.b32.cont [7/16] (narrow) %v1195_v13, 8 }
 0x2c3   :  { %v1213_v36 = vpop.xlane.xlu1 %1212 }
 0x2c4   :  { %v1159_v17 = vpop.xlane.xlu0 %1158 }
 0x2c5   :  { %1306 = vxpose.xlu0.b32.cont [8/16] (narrow) %v1197_v5, 8 }
 0x2c7   :  { %v1161_v48 = vpop.xlane.xlu1 %1160 }
 0x2c8   :  { %v1163_v18 = vpop.xlane.xlu0 %1162 }
 0x2c9   :  { %1307 = vxpose.xlu0.b32.cont [9/16] (narrow) %v1199_v14, 8 }
 0x2cb   :  { %v1165_v61 = vpop.xlane.xlu1 %1164 }
 0x2cc   :  { %v1211_v33 = vpop.xlane.xlu0 %1210 }
 0x2cd   :  { %1308 = vxpose.xlu0.b32.cont [10/16] (narrow) %v1201_v20, 8 }
 0x2d1   :  { %1309 = vxpose.xlu0.b32.cont [11/16] (narrow) %v1203_v19, 8 }
 0x2d5   :  { %1310 = vxpose.xlu0.b32.cont [12/16] (narrow) %v1205_v16, 8 }
 0x2d9   :  { %1311 = vxpose.xlu0.b32.cont [13/16] (narrow) %v1207_v15, 8 }
 0x2dd   :  { %1312 = vxpose.xlu0.b32.cont [14/16] (narrow) %v1209_v21, 8 }
 0x2e1   :  { %1313 = vxpose.xlu0.b32.cont [15/16] (narrow) %v1211_v33, 8 }
 0x2e5   :  { %1314 = vxpose.xlu0.b32.end [16/16] (narrow) %v1213_v36, 8 }
 0x329   :  { %v1315_v44 = vpop.trf.xlu0 }
 0x32a   :  { %v1334_v45 = vrot.slane %v1315_v44, %v1333_v41 }
 0x32c   :  { %v1336_v52 = vadd.f32 %v1334_v45, %v1161_v48  ;;  %v1335_v57 = vadd.f32 %v1334_v45, %v1159_v17  ;;  %v1338_v26 = vadd.f32 %v1334_v45, %v1165_v61  ;;  %v1337_v30 = vadd.f32 %v1334_v45, %v1163_v18 }
 0x32e   :  { %v1719_v49 = vpop.f32.mrb[16].mxu1 }
 0x32f   :  { %v1340_v53 = vmul.f32 2.0, %v1719_v49  ;;  %v1280_v56 = vpop.f32.mrb[17].mxu1 }
 0x330   :  { %v1339_v60 = vmul.f32 2.0, %v1280_v56 }
 0x331   :  { %v1344_v22 = vsub.f32 %v1336_v52, %v1340_v53 }
 0x332   :  { %v1343_v23 = vsub.f32 %v1335_v57, %v1339_v60  ;;  %v1722_v24 = vpop.f32.mrb[18].mxu1 }
 0x333   :  { %v1348_v25 = vmax.f32 %v1344_v22, 0.0  ;;  %v1342_v27 = vmul.f32 2.0, %v1722_v24  ;;  %v1290_v28 = vpop.f32.mrb[19].mxu1 }
 0x334   :  { %v1347_v29 = vmax.f32 %v1343_v23, 0.0  ;;  %v1341_v31 = vmul.f32 2.0, %v1290_v28 }
 0x335   :  { %1865 = vrsqrt.f32 %v1348_v25  ;;  %v1346_v32 = vsub.f32 %v1338_v26, %v1342_v27  ;;  %vm1360_vm1 = vcmp.eq.f32.partialorder %v1348_v25, inf  ;;  %v1363_v46 = vand.u32 2147483648, %v1348_v25 }
 0x336   :  { %1867 = vrsqrt.f32 %v1347_v29  ;;  %v1345_v34 = vsub.f32 %v1337_v30, %v1341_v31  ;;  %vm1353_vm2 = vcmp.eq.f32.partialorder %v1347_v29, inf  ;;  %v1356_v50 = vand.u32 2147483648, %v1347_v29 }
 0x337   :  { %v1350_v35 = vmax.f32 %v1346_v32, 0.0  ;;  %vm1362_vm3 = vcmp.eq.f32.partialorder %v1348_v25, 0.0  ;;  %vm1355_vm4 = vcmp.eq.f32.partialorder %v1347_v29, 0.0 }
 0x338   :  { %v1349_v38 = vmax.f32 %v1345_v34, 0.0 }
 0x339   :  { %1869 = vrsqrt.f32 %v1350_v35  ;;  %vm1374_vm5 = vcmp.eq.f32.partialorder %v1350_v35, inf  ;;  %v1377_v2 = vand.u32 2147483648, %v1350_v35  ;;  %vm1376_vm7 = vcmp.eq.f32.partialorder %v1350_v35, 0.0 }
 0x33a   :  { %1871 = vrsqrt.f32 %v1349_v38  ;;  %vm1367_vm6 = vcmp.eq.f32.partialorder %v1349_v38, inf  ;;  %v1370_v6 = vand.u32 2147483648, %v1349_v38  ;;  %vm1369_vm8 = vcmp.eq.f32.partialorder %v1349_v38, 0.0 }
 0x33f   :  { %v1866_v39 = vpop.eup %1865 }
 0x340   :  { %v1868_v42 = vpop.eup %1867  ;;  %v1359_v43 = vmul.f32 %v1866_v39, %v1348_v25 }
 0x341   :  { %v1352_v47 = vmul.f32 %v1868_v42, %v1347_v29 }
 0x342   :  { %v1361_v51 = vsel %vm1360_vm1, %v1348_v25, %v1359_v43 }
 0x343   :  { %v1870_v54 = vpop.eup %1869  ;;  %v1354_v55 = vsel %vm1353_vm2, %v1347_v29, %v1352_v47  ;;  %v1364_v58 = vsel %vm1362_vm3, %v1363_v46, %v1361_v51 }
 0x344   :  { %v1872_v59 = vpop.eup %1871  ;;  %v1373_v62 = vmul.f32 %v1870_v54, %v1350_v35  ;;  %v1357_v0 = vsel %vm1355_vm4, %v1356_v50, %v1354_v55  ;;  %v1380_v1 = vsub.f32 0.0, %v1364_v58 }
 0x345   :  { %v1366_v3 = vmul.f32 %v1872_v59, %v1349_v38  ;;  %v1379_v4 = vsub.f32 0.0, %v1357_v0 }
 0x346   :  { %v1375_v7 = vsel %vm1374_vm5, %v1350_v35, %v1373_v62  ;;  %1384 = vst [vmem:[#allocation5 + $0x8] sm:$0xff] %v1380_v1 }
 0x347   :  { %v1368_v63 = vsel %vm1367_vm6, %v1349_v38, %v1366_v3  ;;  %v1378_v8 = vsel %vm1376_vm7, %v1377_v2, %v1375_v7  ;;  %1383 = vst [vmem:[#allocation5] sm:$0xff] %v1379_v4 }
 0x348   :  { %v1371_v9 = vsel %vm1369_vm8, %v1370_v6, %v1368_v63  ;;  %v1382_v10 = vsub.f32 0.0, %v1378_v8 }
 0x349   :  { %v1381_v11 = vsub.f32 0.0, %v1371_v9 }
 0x34a   :  { %1386 = vst [vmem:[#allocation5 + $0x18] sm:$0xff] %v1382_v10 }
 0x34b   :  { %1385 = vst [vmem:[#allocation5 + $0x10] sm:$0xff] %v1381_v11 }
 0x34c   :  { %1906 = shalt.err (!%p1903_p12)
}
 0x34d   :  { %s1907_s15 = scalar_lea.hbm %s2195_s4, 512 }
 0x34e   :  { %p1908_p13 = scmp.ne.s32.totalorder %s2195_s4, %s1907_s15  ;;  %p1911_p0 = scmp.lt.u32.totalorder %s1907_s15, %s2195_s4 }
 0x350   :  { %p1913_p1 = pnand %p1911_p0, %p1908_p13 }
 0x352   :  { %1916 = shalt.err (!%p1913_p1)
}
 0x353   :  { %s1925_s20 = smov 128   ;;  %s1926_s21 = smov 8  }
 0x354   :  { %1398 = dma.vmem_to_hbm [thread:$0]  %s1393_s3, 512, %s2195_s4, [#allocation4], %s1925_s20, %s1925_s20, %s1926_s21  }
 0x355   :  { %1919 = dma.done.wait [#allocation4], 512  }
 0x356   :  { %1920 = vsyncadd [#allocation4], 4294966784 }
 0x357   :  { %1402 = vsyncpa [#allocation3], 1 }
 0x358   :  { %1403 = vsyncpa [#allocation4], 1 }

</bundles_post_ra>
